<compile_context>
chip_gen: v7x
topology: tpu7x:2x2x1
jax: 0.10.0
libtpu: 0.0.40
codegen_flags: <defaults>
</compile_context>

<pallas_src>
import functools

import jax
import jax.numpy as jnp
from jax import lax
from jax.experimental import pallas as pl
from jax.experimental.pallas import tpu as pltpu

_NEG_INF = float("-inf")


def _vmem_capacity_bytes():
    try:
        return int(pltpu.get_tpu_info().vmem_capacity_bytes)
    except Exception:  # interpret mode / older runtimes
        return 64 << 20


def _channel_attention_kernel(x_ref, w1_ref, w2_ref, o_ref,
                              sum_acc, max_acc,
                              *, hw_total, hw_tile, grid_hw, slab):
    # x_ref: (B_t, C, hw_tile)   w1_ref: (Cr, C)   w2_ref: (C, Cr)
    # o_ref: (B_t, 1, C)         sum_acc/max_acc: (B_t, C, slab) f32 scratch
    hw_idx = pl.program_id(1)
    last_hw = pl.num_programs(1) - 1

    @pl.when(hw_idx == 0)
    def _init():
        sum_acc[...] = jnp.zeros_like(sum_acc)
        max_acc[...] = jnp.full_like(max_acc, -jnp.inf)

    n_slabs = -(-hw_tile // slab)
    last_tile_start = (grid_hw - 1) * hw_tile
    # Slabs that can never cross hw_total, even on the last grid step.
    n_clean = min(n_slabs, max(0, (hw_total - last_tile_start) // slab))

    def accum_full_slab(lo):
        xs = x_ref[:, :, pl.ds(lo, slab)].astype(jnp.float32)
        sum_acc[...] = sum_acc[...] + xs
        max_acc[...] = jnp.maximum(max_acc[...], xs)

    if n_clean > 0:
        if n_clean <= 8:
            for k in range(n_clean):
                accum_full_slab(k * slab)
        else:
            @pl.loop(0, n_clean)
            def _clean(k):
                accum_full_slab(pl.multiple_of(k * slab, slab))

    if grid_hw == 1:
        # Single-block path: at most one narrower final slab, never masked.
        for k in range(n_clean, n_slabs):
            lo = k * slab
            w = hw_tile - lo
            xs = x_ref[:, :, pl.ds(lo, w)].astype(jnp.float32)
            sum_acc[:, :, :w] = sum_acc[:, :, :w] + xs
            max_acc[:, :, :w] = jnp.maximum(max_acc[:, :, :w], xs)
    elif n_clean < n_slabs:
        # Streamed ragged reduction: remaining slabs cross hw_total only on
        # the last grid step -> mask there, plain accumulate on other steps.
        def tail(masked):
            for k in range(n_clean, n_slabs):
                lo = k * slab
                xs = x_ref[:, :, pl.ds(lo, slab)].astype(jnp.float32)
                if masked:
                    lane = lax.broadcasted_iota(jnp.int32, (1, 1, slab), 2)
                    valid = (last_tile_start + lo + lane) < hw_total
                    xs_s = jnp.where(valid, xs, 0.0)
                    xs_m = jnp.where(valid, xs, _NEG_INF)
                else:
                    xs_s = xs_m = xs
                sum_acc[...] = sum_acc[...] + xs_s
                max_acc[...] = jnp.maximum(max_acc[...], xs_m)

        @pl.when(hw_idx == last_hw)
        def _tail_masked():
            tail(True)

        @pl.when(hw_idx != last_hw)
        def _tail_plain():
            tail(False)

    @pl.when(hw_idx == last_hw)
    def _epilogue():
        b_t = o_ref.shape[0]
        avg = jnp.sum(sum_acc[...], axis=-1) * (1.0 / hw_total)   # (B_t, C)
        mx = jnp.max(max_acc[...], axis=-1)                       # (B_t, C)

        # Fused MLP on stacked (avg; max) rows: one fc1->ReLU->fc2 pass.
        pooled = jnp.concatenate([avg, mx], axis=0)               # (2*B_t, C)
        w1 = w1_ref[...]
        w2 = w2_ref[...]
        lhs1 = pooled if w1.dtype == jnp.float32 else pooled.astype(w1.dtype)
        h = lax.dot_general(lhs1, w1, (((1,), (1,)), ((), ())),
                            preferred_element_type=jnp.float32)   # (2*B_t, Cr)
        h = jnp.maximum(h, 0.0)
        lhs2 = h if w2.dtype == jnp.float32 else h.astype(w2.dtype)
        y = lax.dot_general(lhs2, w2, (((1,), (1,)), ((), ())),
                            preferred_element_type=jnp.float32)   # (2*B_t, C)
        gate = jax.nn.sigmoid(y[:b_t] + y[b_t:])                  # (B_t, C)
        o_ref[...] = gate.astype(o_ref.dtype).reshape(o_ref.shape)


def channel_attention(x, w1, w2, *, b_tile=None, hw_tile=None):
    """x: (B, C, H, W); w1: (C//r, C); w2: (C, C//r) (squeezed 1x1-conv weights).
    Returns the sigmoid channel gate of shape (B, C, 1, 1), matching PyTorch."""
    B, C, H, W = x.shape
    Cr = w1.shape[0]
    assert w1.shape == (Cr, C) and w2.shape == (C, Cr)
    hw_total = H * W
    x_flat = x.reshape(B, C, hw_total)
    itemsize = x.dtype.itemsize

    vmem_cap = _vmem_capacity_bytes()
    # Per-x-buffer streaming budget (the x stream is double/triple buffered).
    budget = int(min(8 << 20, max(2 << 20, vmem_cap // 8)))

    if b_tile is None:
        if B <= 1:
            b_tile = 1
        else:
            # >= 2 steps on the "parallel" batch axis (v7x megacore split) and
            # B % b_tile == 0 so no ragged batch tile is ever read.
            cap = min(8, max(1, (B + 1) // 2))
            b_tile = max(d for d in range(1, cap + 1) if B % d == 0)
        if b_tile * C * min(128, hw_total) * itemsize > budget:
            b_tile = 1   # very large C: keep one 128-lane slab within budget

    if hw_tile is None:
        row_bytes = b_tile * C * itemsize
        if hw_total * row_bytes <= budget:
            # Whole spatial extent in one block: no reduction grid steps,
            # no mask, one contiguous DMA per (b, c) row.
            hw_tile = hw_total
        else:
            lanes = (budget // row_bytes) // 128 * 128
            hw_tile = min(max(128, lanes), (hw_total // 128) * 128)
    else:
        hw_tile = min(hw_tile, hw_total)
        if hw_tile != hw_total and hw_tile % 128 != 0:
            raise ValueError("hw_tile must be a multiple of 128 or the full H*W")

    grid_b = pl.cdiv(B, b_tile)
    grid_hw = pl.cdiv(hw_total, hw_tile)
    slab = min(128, hw_tile)

    kernel = functools.partial(
        _channel_attention_kernel,
        hw_total=hw_total, hw_tile=hw_tile, grid_hw=grid_hw, slab=slab)

    # Deeper buffering only helps when there are many small streamed tiles.
    x_block_bytes = b_tile * C * hw_tile * itemsize
    n_bufs = 3 if (grid_hw >= 8 and x_block_bytes < (1 << 20)) else 2
    x_spec_kwargs = {"pipeline_mode": pl.Buffered(3)} if n_bufs == 3 else {}
    x_spec = pl.BlockSpec((b_tile, C, hw_tile), lambda b, h: (b, 0, h),
                          **x_spec_kwargs)

    w_bytes = w1.size * w1.dtype.itemsize + w2.size * w2.dtype.itemsize
    out_block_bytes = b_tile * C * itemsize
    scratch_bytes = 2 * b_tile * C * slab * 4
    vmem_need = (n_bufs * x_block_bytes + 2 * w_bytes + 2 * out_block_bytes
                 + scratch_bytes + (2 << 20))
    vmem_limit = int(min(vmem_cap * 7 // 8, max(vmem_need, 16 << 20)))

    cost = pl.CostEstimate(
        flops=3 * B * C * hw_total + 2 * 2 * (2 * B) * C * Cr,
        transcendentals=B * C,
        bytes_accessed=(x_flat.size * itemsize + w_bytes + B * C * itemsize),
    )

    gate = pl.pallas_call(
        kernel,
        out_shape=jax.ShapeDtypeStruct((B, 1, C), x.dtype),
        grid=(grid_b, grid_hw),
        in_specs=[
            x_spec,
            pl.BlockSpec((Cr, C), lambda b, h: (0, 0)),
            pl.BlockSpec((C, Cr), lambda b, h: (0, 0)),
        ],
        out_specs=pl.BlockSpec((b_tile, 1, C), lambda b, h: (b, 0, 0)),
        scratch_shapes=[
            pltpu.VMEM((b_tile, C, slab), jnp.float32),   # running sum
            pltpu.VMEM((b_tile, C, slab), jnp.float32),   # running max
        ],
        compiler_params=pltpu.CompilerParams(
            dimension_semantics=("parallel", "arbitrary"),
            vmem_limit_bytes=vmem_limit),
        cost_estimate=cost,
    )(x_flat, w1, w2)

    return gate.reshape(B, C, 1, 1)


def _reference(x, w1, w2):
    # Pure-JAX mirror of the PyTorch forward pass.
    avg = jnp.mean(x, axis=(2, 3))
    mx = jnp.max(x, axis=(2, 3))

    def mlp(v):
        return jnp.maximum(v @ w1.T, 0.0) @ w2.T

    return jax.nn.sigmoid(mlp(avg) + mlp(mx))[:, :, None, None]


if __name__ == "__main__":
    key = jax.random.PRNGKey(0)
    B, C, H, W = 2, 64, 16, 16
    reduction_ratio = 16
    Cr = C // reduction_ratio

    kx, k1, k2 = jax.random.split(key, 3)
    x = jax.random.normal(kx, (B, C, H, W), dtype=jnp.float32)
    # Squeezed 1x1-conv weights with kaiming-uniform-ish scale.
    w1 = jax.random.uniform(k1, (Cr, C), jnp.float32, -1.0, 1.0) * (1.0 / jnp.sqrt(C))
    w2 = jax.random.uniform(k2, (C, Cr), jnp.float32, -1.0, 1.0) * (1.0 / jnp.sqrt(Cr))

    # 1) Default tiling: whole H*W in one block (grid_hw == 1, no mask).
    out = jax.block_until_ready(channel_attention(x, w1, w2))
    ref = _reference(x, w1, w2)
    assert out.shape == (B, C, 1, 1)
    assert jnp.allclose(out, ref, rtol=1e-5, atol=1e-5)

    # 2) Ragged streamed reduction (H*W = 200, hw_tile = 128 -> masked tail
    #    on the last grid step only).
    x2 = jax.random.normal(jax.random.PRNGKey(1), (B, C, 20, 10), dtype=jnp.float32)
    out2 = jax.block_until_ready(channel_attention(x2, w1, w2, hw_tile=128))
    assert jnp.allclose(out2, _reference(x2, w1, w2), rtol=1e-5, atol=1e-5)

    # 3) Many small HW steps -> exercises the deeper-buffered (Buffered(3)) x stream.
    x3 = jax.random.normal(jax.random.PRNGKey(2), (B, C, 32, 32), dtype=jnp.float32)
    out3 = jax.block_until_ready(channel_attention(x3, w1, w2, hw_tile=128))
    assert jnp.allclose(out3, _reference(x3, w1, w2), rtol=1e-5, atol=1e-5)

    # 4) Larger single-block spatial extent -> exercises the pl.loop slab path.
    x4 = jax.random.normal(jax.random.PRNGKey(3), (B, C, 48, 48), dtype=jnp.float32)
    out4 = jax.block_until_ready(channel_attention(x4, w1, w2))
    assert jnp.allclose(out4, _reference(x4, w1, w2), rtol=1e-5, atol=1e-5)

    print("KERNEL_OK")
</pallas_src>

<mosaic_0001>
module attributes {stable_mosaic.version = 11 : i64} {
  func.func @_channel_attention_kernel(%arg0: i32, %arg1: i32, %arg2: memref<1x64x256xf32, #tpu.memory_space<vmem>>, %arg3: memref<4x64xf32, #tpu.memory_space<vmem>>, %arg4: memref<64x4xf32, #tpu.memory_space<vmem>>, %arg5: memref<1x1x64xf32, #tpu.memory_space<vmem>>, %arg6: memref<1x64x128xf32, #tpu.memory_space<vmem>>, %arg7: memref<1x64x128xf32, #tpu.memory_space<vmem>>) attributes {dimension_semantics = [#tpu.dimension_semantics<parallel>, #tpu.dimension_semantics<arbitrary>], iteration_bounds = array<i64: 2, 1>, scalar_prefetch = 0 : i64, scratch_operands = 2 : i64, tpu.core_type = #tpu.core_type<tc>, window_params = [{transform_indices = @transform_0, window_bounds = array<i64: 1, 64, 256>}, {pipeline_mode = #tpu.pipeline_mode<synchronous>, transform_indices = @transform_1, window_bounds = array<i64: 4, 64>}, {pipeline_mode = #tpu.pipeline_mode<synchronous>, transform_indices = @transform_2, window_bounds = array<i64: 64, 4>}, {transform_indices = @transform_3, window_bounds = array<i64: 1, 1, 64>}]} {
    %c0_i32 = arith.constant 0 : i32
    %0 = arith.cmpi eq, %arg1, %c0_i32 : i32
    %1 = arith.extui %0 : i1 to i32
    %c0_i32_0 = arith.constant 0 : i32
    %2 = arith.cmpi ne, %1, %c0_i32_0 : i32
    scf.if %2 {
      %cst = arith.constant 0.000000e+00 : f32
      %20 = vector.broadcast %cst : f32 to vector<1x64x128xf32>
      %c0_31 = arith.constant 0 : index
      %c0_32 = arith.constant 0 : index
      %c0_33 = arith.constant 0 : index
      %21 = vector.load %arg6[%c0_31, %c0_32, %c0_33] : memref<1x64x128xf32, #tpu.memory_space<vmem>>, vector<1x64x128xf32>
      tpu.vector_store %arg6[%c0_31, %c0_32, %c0_33], %20 {strides = array<i32>} : memref<1x64x128xf32, #tpu.memory_space<vmem>>, vector<1x64x128xf32>,
      %cst_34 = arith.constant 0xFF800000 : f32
      %22 = vector.broadcast %cst_34 : f32 to vector<1x64x128xf32>
      %c0_35 = arith.constant 0 : index
      %c0_36 = arith.constant 0 : index
      %c0_37 = arith.constant 0 : index
      %23 = vector.load %arg7[%c0_35, %c0_36, %c0_37] : memref<1x64x128xf32, #tpu.memory_space<vmem>>, vector<1x64x128xf32>
      tpu.vector_store %arg7[%c0_35, %c0_36, %c0_37], %22 {strides = array<i32>} : memref<1x64x128xf32, #tpu.memory_space<vmem>>, vector<1x64x128xf32>,
    } else {
    }
    %c0 = arith.constant 0 : index
    %c0_1 = arith.constant 0 : index
    %c0_2 = arith.constant 0 : index
    %3 = vector.load %arg2[%c0, %c0_1, %c0_2] : memref<1x64x256xf32, #tpu.memory_space<vmem>>, vector<1x64x128xf32>
    %c0_3 = arith.constant 0 : index
    %c0_4 = arith.constant 0 : index
    %c0_5 = arith.constant 0 : index
    %4 = vector.load %arg6[%c0_3, %c0_4, %c0_5] : memref<1x64x128xf32, #tpu.memory_space<vmem>>, vector<1x64x128xf32>
    %5 = arith.addf %4, %3 : vector<1x64x128xf32>
    %c0_6 = arith.constant 0 : index
    %c0_7 = arith.constant 0 : index
    %c0_8 = arith.constant 0 : index
    %6 = vector.load %arg6[%c0_6, %c0_7, %c0_8] : memref<1x64x128xf32, #tpu.memory_space<vmem>>, vector<1x64x128xf32>
    tpu.vector_store %arg6[%c0_6, %c0_7, %c0_8], %5 {strides = array<i32>} : memref<1x64x128xf32, #tpu.memory_space<vmem>>, vector<1x64x128xf32>,
    %c0_9 = arith.constant 0 : index
    %c0_10 = arith.constant 0 : index
    %c0_11 = arith.constant 0 : index
    %7 = vector.load %arg7[%c0_9, %c0_10, %c0_11] : memref<1x64x128xf32, #tpu.memory_space<vmem>>, vector<1x64x128xf32>
    %8 = arith.maximumf %7, %3 : vector<1x64x128xf32>
    %c0_12 = arith.constant 0 : index
    %c0_13 = arith.constant 0 : index
    %c0_14 = arith.constant 0 : index
    %9 = vector.load %arg7[%c0_12, %c0_13, %c0_14] : memref<1x64x128xf32, #tpu.memory_space<vmem>>, vector<1x64x128xf32>
    tpu.vector_store %arg7[%c0_12, %c0_13, %c0_14], %8 {strides = array<i32>} : memref<1x64x128xf32, #tpu.memory_space<vmem>>, vector<1x64x128xf32>,
    %c0_15 = arith.constant 0 : index
    %c0_16 = arith.constant 0 : index
    %c128 = arith.constant 128 : index
    %10 = vector.load %arg2[%c0_15, %c0_16, %c128] : memref<1x64x256xf32, #tpu.memory_space<vmem>>, vector<1x64x128xf32>
    %c0_17 = arith.constant 0 : index
    %c0_18 = arith.constant 0 : index
    %c0_19 = arith.constant 0 : index
    %11 = vector.load %arg6[%c0_17, %c0_18, %c0_19] : memref<1x64x128xf32, #tpu.memory_space<vmem>>, vector<1x64x128xf32>
    %12 = arith.addf %11, %10 : vector<1x64x128xf32>
    %c0_20 = arith.constant 0 : index
    %c0_21 = arith.constant 0 : index
    %c0_22 = arith.constant 0 : index
    %13 = vector.load %arg6[%c0_20, %c0_21, %c0_22] : memref<1x64x128xf32, #tpu.memory_space<vmem>>, vector<1x64x128xf32>
    tpu.vector_store %arg6[%c0_20, %c0_21, %c0_22], %12 {strides = array<i32>} : memref<1x64x128xf32, #tpu.memory_space<vmem>>, vector<1x64x128xf32>,
    %c0_23 = arith.constant 0 : index
    %c0_24 = arith.constant 0 : index
    %c0_25 = arith.constant 0 : index
    %14 = vector.load %arg7[%c0_23, %c0_24, %c0_25] : memref<1x64x128xf32, #tpu.memory_space<vmem>>, vector<1x64x128xf32>
    %15 = arith.maximumf %14, %10 : vector<1x64x128xf32>
    %c0_26 = arith.constant 0 : index
    %c0_27 = arith.constant 0 : index
    %c0_28 = arith.constant 0 : index
    %16 = vector.load %arg7[%c0_26, %c0_27, %c0_28] : memref<1x64x128xf32, #tpu.memory_space<vmem>>, vector<1x64x128xf32>
    tpu.vector_store %arg7[%c0_26, %c0_27, %c0_28], %15 {strides = array<i32>} : memref<1x64x128xf32, #tpu.memory_space<vmem>>, vector<1x64x128xf32>,
    %c0_i32_29 = arith.constant 0 : i32
    %17 = arith.cmpi eq, %arg1, %c0_i32_29 : i32
    %18 = arith.extui %17 : i1 to i32
    %c0_i32_30 = arith.constant 0 : i32
    %19 = arith.cmpi ne, %18, %c0_i32_30 : i32
    scf.if %19 {
      %c0_31 = arith.constant 0 : index
      %c0_32 = arith.constant 0 : index
      %c0_33 = arith.constant 0 : index
      %20 = vector.load %arg6[%c0_31, %c0_32, %c0_33] : memref<1x64x128xf32, #tpu.memory_space<vmem>>, vector<1x64x128xf32>
      %cst = arith.constant dense<0.000000e+00> : vector<1x64xf32>
      %21 = vector.multi_reduction <add>, %20, %cst [2] : vector<1x64x128xf32> to vector<1x64xf32>
      %cst_34 = arith.constant 3.906250e-03 : f32
      %22 = vector.broadcast %cst_34 : f32 to vector<1x64xf32>
      %23 = arith.mulf %21, %22 : vector<1x64xf32>
      %c0_35 = arith.constant 0 : index
      %c0_36 = arith.constant 0 : index
      %c0_37 = arith.constant 0 : index
      %24 = vector.load %arg7[%c0_35, %c0_36, %c0_37] : memref<1x64x128xf32, #tpu.memory_space<vmem>>, vector<1x64x128xf32>
      %cst_38 = arith.constant dense<0xFF800000> : vector<1x64xf32>
      %25 = vector.multi_reduction <maximumf>, %24, %cst_38 [2] : vector<1x64x128xf32> to vector<1x64xf32>
      %26 = tpu.concatenate %23, %25 in 0 : vector<1x64xf32>, vector<1x64xf32> -> vector<2x64xf32>
      %c0_39 = arith.constant 0 : index
      %c0_40 = arith.constant 0 : index
      %27 = vector.load %arg3[%c0_39, %c0_40] : memref<4x64xf32, #tpu.memory_space<vmem>>, vector<4x64xf32>
      %c0_41 = arith.constant 0 : index
      %c0_42 = arith.constant 0 : index
      %28 = vector.load %arg4[%c0_41, %c0_42] : memref<64x4xf32, #tpu.memory_space<vmem>>, vector<64x4xf32>
      %cst_43 = arith.constant dense<0.000000e+00> : vector<2x4xf32>
      %29 = tpu.matmul %26, %27, %cst_43 {dimension_numbers = #tpu.dot_dimension_numbers<[1], [1], [0], [0], [0, 0, 1, 0], [], []>} : vector<2x64xf32>, vector<4x64xf32>, vector<2x4xf32> -> vector<2x4xf32>
      %cst_44 = arith.constant 0.000000e+00 : f32
      %30 = vector.broadcast %cst_44 : f32 to vector<2x4xf32>
      %31 = arith.maximumf %29, %30 : vector<2x4xf32>
      %cst_45 = arith.constant dense<0.000000e+00> : vector<2x64xf32>
      %32 = tpu.matmul %31, %28, %cst_45 {dimension_numbers = #tpu.dot_dimension_numbers<[1], [1], [0], [0], [0, 0, 1, 0], [], []>} : vector<2x4xf32>, vector<64x4xf32>, vector<2x64xf32> -> vector<2x64xf32>
      %33 = vector.extract_strided_slice %32 {offsets = [0, 0], sizes = [1, 64], strides = [1, 1]} : vector<2x64xf32> to vector<1x64xf32>
      %34 = vector.extract_strided_slice %32 {offsets = [1, 0], sizes = [1, 64], strides = [1, 1]} : vector<2x64xf32> to vector<1x64xf32>
      %35 = arith.addf %33, %34 : vector<1x64xf32>
      %36 = arith.negf %35 : vector<1x64xf32>
      %37 = math.exp %36 : vector<1x64xf32>
      %cst_46 = arith.constant 1.000000e+00 : f32
      %38 = vector.broadcast %cst_46 : f32 to vector<1x64xf32>
      %39 = arith.addf %38, %37 : vector<1x64xf32>
      %40 = arith.divf %38, %39 : vector<1x64xf32>
      %41 = vector.shape_cast %40 : vector<1x64xf32> to vector<1x1x64xf32>
      %c0_47 = arith.constant 0 : index
      %c0_48 = arith.constant 0 : index
      %c0_49 = arith.constant 0 : index
      %42 = vector.load %arg5[%c0_47, %c0_48, %c0_49] : memref<1x1x64xf32, #tpu.memory_space<vmem>>, vector<1x1x64xf32>
      tpu.vector_store %arg5[%c0_47, %c0_48, %c0_49], %41 {strides = array<i32>} : memref<1x1x64xf32, #tpu.memory_space<vmem>>, vector<1x1x64xf32>,
    } else {
    }
    return
  }
  func.func @transform_0(%arg0: i32, %arg1: i32) -> (i32, i32, i32) {
    %c0_i32 = arith.constant 0 : i32
    %c0_i32_0 = arith.constant 0 : i32
    return %arg0, %c0_i32, %arg1 : i32, i32, i32
  }
  func.func @transform_1(%arg0: i32, %arg1: i32) -> (i32, i32) {
    %c0_i32 = arith.constant 0 : i32
    %c0_i32_0 = arith.constant 0 : i32
    %c0_i32_1 = arith.constant 0 : i32
    return %c0_i32, %c0_i32_0 : i32, i32
  }
  func.func @transform_2(%arg0: i32, %arg1: i32) -> (i32, i32) {
    %c0_i32 = arith.constant 0 : i32
    %c0_i32_0 = arith.constant 0 : i32
    %c0_i32_1 = arith.constant 0 : i32
    return %c0_i32, %c0_i32_0 : i32, i32
  }
  func.func @transform_3(%arg0: i32, %arg1: i32) -> (i32, i32, i32) {
    %c0_i32 = arith.constant 0 : i32
    %c0_i32_0 = arith.constant 0 : i32
    %c0_i32_1 = arith.constant 0 : i32
    return %arg0, %c0_i32, %c0_i32_0 : i32, i32, i32
  }
}

</mosaic_0001>

<bundles_post_ra>
// kernel: tpu_custom_call.1
= control target key start
LH: loop header
LB: loop body
LE: loop exit
PB: predicated region body
PF: predicated region fallthrough
CT: control target
= control target key end

     0   :  { %8 = vsyncpa [#allocation5], 0  ;;  %s1329_s0 = inlined_call_operand.hbm [shape: f32[2,64,256], index: 0, kind: input, shape index: {}]   ;;  %s1330_s1 = inlined_call_operand.vmem [shape: f32[4,64], index: 1, kind: input, shape index: {}]   ;;  %s1331_s2 = inlined_call_operand.vmem [shape: f32[64,4], index: 2, kind: input, shape index: {}]   ;;  %s1332_s3 = inlined_call_operand.hbm [shape: f32[2,1,64], index: 3, kind: output, shape index: {}]  }
   0x1   :  { %10 = vsyncpa [#allocation5 + $0x1], 0 }
   0x2   :  { %11 = vsyncpa [#allocation6], 0 }
   0x3   :  { %13 = vsyncpa [#allocation6 + $0x1], 0  ;;  %s1085_s12 = smov 0   ;;  %s1087_s13 = smov 0  }
   0x4   :  { %s1089_s14 = smov 0   ;;  %s1091_s15 = smov 0  }
   0x5   :  { %s1093_s16 = smov 0   ;;  %s1095_s17 = smov 0  }
   0x6 LB: > { %s797_s18 = sadd.s32 4294967295, %s1056_s17   ;;  %s798_s19 = sadd.s32 4294967294, %s1056_s17   ;;  %s1056_s17 = sphi %s1095_s17, %s19_s17   ;;  %s1052_s16 = sphi %s1093_s16, %s1349_s16   ;;  %s1048_s15 = sphi %s1091_s15, %s1348_s15   ;;  %s1044_s14 = sphi %s1089_s14, %s1347_s14   ;;  %s1040_s13 = sphi %s1087_s13, %s1346_s13   ;;  %s1036_s12 = sphi %s1085_s12, %s1345_s12  }
   0x7   : > { %s31_s20 = sadd.s32 1, %s1052_s16  ;;  %s40_s21 = sadd.s32 1, %s1044_s14 }
   0x8   : > { %p33_p0 = scmp.ge.s32.totalorder %s31_s20, 2  ;;  %p47_p1 = scmp.ne.s32.totalorder %s1044_s14, %s1040_s13 }
   0x9   : > { %p48_p2 = scmp.eq.s32.totalorder %s1056_s17, 0  ;;  %p53_p3 = scmp.ne.s32.totalorder %s1040_s13, %s1036_s12 }
   0xa   : > { %s1351_s20 = smov (%p33_p0, %s31_s20), 0  ;;  %p54_p5 = scmp.eq.s32.totalorder %s797_s18, 0 }
   0xb   : > { %p1126_p4 = por %p48_p2, %p47_p1  ;;  %s35_s23 = ssub.s32 %s1052_s16, %s1351_s20 }
   0xc   : > { %p119_p6 = scmp.eq.s32.totalorder %s797_s18, 1  ;;  %p38_p7 = scmp.eq.s32.totalorder %s35_s23, 0 }
   0xd   : > { %p1132_p8 = por %p54_p5, %p53_p3  ;;  %p125_p10 = scmp.eq.s32.totalorder %s798_s19, 1 }
   0xe   : > { %p1136_p9 = por %p119_p6, %p47_p1  ;;  %p885_p13 = scmp.lt.s32.totalorder %s1056_s17, 2 }
   0xf   : > { %s1141_s26 = scalar_select %p38_p7, %s1044_s14, %s40_s21  }
  0x10   : > { %s1336_s25 = scalar_select %p1136_p9, 1, 0 }
  0x11   : > { %p1143_p11 = por %p125_p10, %p53_p3  ;;  %s151_s28 = sand.u32 1, %s1044_s14  }
  0x12   : > { %s801_s29 = sshll.u32 %s151_s28, 7  ;;  %s821_s30 = sshll.u32 %s1052_s16, 11 }
  0x13   : > { %s1337_s27 = scalar_select %p1143_p11, 1, 0 }
  0x14   : > { %s1154_s6 = scalar_lea.hbm %s1329_s0, %s821_s30  ;;  %s155_s7 = scalar_lea.vmem [#allocation4], %s801_s29 }
  0x15   : > { %s164_s8 = sshll.u32 %s155_s7, 4  ;;  %p1160_p0 = pnand %p885_p13, %p1126_p4  ;;  %s1156_s8 = int_to_ptr.vmem [resolvable:$true] %s164_s8 }
  0x16   : > { %s1165_s10 = scalar_lea.sflag [#allocation5], %s151_s28  ;;  %s944_s11 = scalar_lea.hbm %s1154_s6, 2048 }
  0x17   : > { %p945_p2 = scmp.ne.s32.totalorder %s1154_s6, %s944_s11  ;;  %p946_p3 = pneg %p1160_p0 }
  0x18   : > { %s949_s21 = scalar_lea.hbm %s1329_s0, 4096  ;;  %p950_p4 = scmp.lt.u32.totalorder %s1154_s6, %s1329_s0 }
  0x19   : > { %p947_p5 = pnand %p946_p3, %p945_p2  ;;  %p951_p7 = scmp.lt.u32.totalorder %s949_s21, %s944_s11 }
  0x1a   : > { %p953_p13 = scmp.lt.u32.totalorder %s944_s11, %s1154_s6 }
  0x1b   : > { %p948_p6 = pneg %p947_p5  ;;  %p952_p10 = por %p951_p7, %p950_p4 }
  0x1d   : > { %p954_p12 = por %p953_p13, %p952_p10 }
  0x1f   : > { %p955_p1 = pnand %p954_p12, %p948_p6 }
  0x21   : > { %958 = shalt.err (!%p955_p1)
}
  0x22   : > { %s959_s28 = scalar_lea.vmem %s1156_s8, 2048  ;;  %s1058_s29 = smov [#allocation4]  }
  0x23   : > { %p960_p2 = scmp.ne.s32.totalorder %s1156_s8, %s959_s28  ;;  %s964_s30 = sshll.u32 %s1058_s29, 4  ;;  %s965_s30 = int_to_ptr.vmem [resolvable:$false] %s964_s30 }
  0x24   : > { %s966_s4 = scalar_lea.vmem %s965_s30, 4096  ;;  %p967_p9 = scmp.lt.s32.totalorder %s1156_s8, %s965_s30 }
  0x25   : > { %p962_p5 = pnand %p960_p2, %p946_p3  ;;  %p968_p4 = scmp.lt.s32.totalorder %s966_s4, %s959_s28 }
  0x27   : > { %p963_p11 = pneg %p962_p5  ;;  %p969_p7 = por %p968_p4, %p967_p9 }
  0x29   : > { %p970_p10 = pnand %p969_p7, %p963_p11 }
  0x2b   : > { %973 = shalt.err (!%p970_p10)
}
  0x2c   : > { %s1059_s5 = smov 256   ;;  %s1060_s7 = smov 16  }
  0x2d   : > { %880 = dma.hbm_to_vmem [thread:$0]  (!%p1160_p0), %s1154_s6, 2048, %s1156_s8, %s1165_s10, %s1059_s5, %s1059_s5, %s1060_s7  }
  0x2e   : > { %p172_p12 = scmp.lt.s32.totalorder %s1056_s17, 3  ;;  %p1339_p1 = scmp.ge.s32.totalorder %s1056_s17, 1 }
  0x30   : > { %p173_p3 = pnand %p1339_p1, %p172_p12 }
  0x31   : > { %s1197_s11 = sand.u32 (!%p173_p3), 1, %s1040_s13  }
  0x32   : > { %176 = sbr.rel (%p173_p3) target bundleno = 707 (0x2c3), region = 32  ;;  %s805_s18 = sshll.u32 (!%p173_p3), %s1197_s11, 7 }
  0x33   : > { %s179_s19 = scalar_lea.sflag (!%p173_p3), [#allocation5], %s1197_s11  ;;  %s1201_s21 = scalar_lea.vmem (!%p173_p3), [#allocation4], %s805_s18 }
  0x39   : > { %1027 = dma.done.wait (%p1132_p8), %s179_s19, 2048  }
  0x3a   : > { %1029 = vsyncadd (%p1132_p8), %s179_s19, 4294965248  ;;  %v227_v0 = vld [vmem:[%s1201_s21 + $0x20] sm:$0xff]  ;;  %v283_v1 = vld [vmem:[%s1201_s21 + $0x28] sm:$0xff]  ;;  %v1061_v32 = vmov 0.0   ;;  %vm519_vm0 = vcmask 523264   ;;  %vm1062_vm1 = vmmov 0   ;;  %v404_v51 = vlaneseq }
  0x3b   : > { %v225_v2 = vld [vmem:[%s1201_s21] sm:$0xff]  ;;  %v299_v3 = vadd.f32 %v283_v1, %v227_v0  ;;  %v281_v4 = vld [vmem:[%s1201_s21 + $0x8] sm:$0xff]  ;;  %v228_v5 = vld [vmem:[%s1201_s21 + $0x30] sm:$0xff]  ;;  %v323_v16 = vmax.f32 %v227_v0, %v283_v1  ;;  %833 = vmatprep.subr.mxu0 %v1061_v32  ;;  %835 = vmatprep.mubr.msk.f32.mxu0 %vm1062_vm1, %v1061_v32  ;;  %vm597_vm2 = vcmask 31744   ;;  %v1063_v36 = vmov 0.0|0.0   ;;  %s818_s8 = sshll.u32 %s1048_s15, 4 }
  0x3c   : > { %v284_v6 = vld [vmem:[%s1201_s21 + $0x38] sm:$0xff]  ;;  %v297_v7 = vadd.f32 %v281_v4, %v225_v2  ;;  %v226_v8 = vld [vmem:[%s1201_s21 + $0x10] sm:$0xff]  ;;  %v321_v13 = vmax.f32 %v225_v2, %v281_v4  ;;  %v229_v14 = vld [vmem:[%s1201_s21 + $0x40] sm:$0xff]  ;;  %854 = vmatprep.mubr.msk.f32.mxu1 %vm1062_vm1, %v1061_v32  ;;  %857 = vmatprep.subr.bf16.mxu1 %v1063_v36  ;;  %v405_v54 = vand.u32 127, %v404_v51  ;;  %v407_v58 = vshrl.u32 %v404_v51, 7  ;;  %s203_s9 = scalar_lea.vmem [#allocation7], %s1197_s11  ;;  %s1280_s28 = scalar_lea.hbm %s1332_s3, %s818_s8 }
  0x3d   : > { %v282_v9 = vld [vmem:[%s1201_s21 + $0x18] sm:$0xff]  ;;  %352 = vadd.xlane.f32.xlu1 %v299_v3  ;;  %v300_v10 = vadd.f32 %v284_v6, %v228_v5  ;;  %v285_v15 = vld [vmem:[%s1201_s21 + $0x48] sm:$0xff]  ;;  %v230_v18 = vld [vmem:[%s1201_s21 + $0x50] sm:$0xff]  ;;  %v324_v20 = vmax.f32 %v228_v5, %v284_v6  ;;  %vm415_vm4 = vcmask 130112   ;;  %vm422_vm5 = vcmask 195712   ;;  %s720_s10 = sshll.u32 %s203_s9, 4  ;;  %s1282_s10 = int_to_ptr.vmem [resolvable:$true] %s720_s10 }
  0x3e   : > { %348 = vadd.xlane.f32.xlu0 %v297_v7  ;;  %v298_v11 = vadd.f32 %v282_v9, %v226_v8  ;;  %v322_v12 = vmax.f32 %v226_v8, %v282_v9  ;;  %v301_v17 = vadd.f32 %v285_v15, %v229_v14  ;;  %v286_v19 = vld [vmem:[%s1201_s21 + $0x58] sm:$0xff]  ;;  %v231_v22 = vld [vmem:[%s1201_s21 + $0x60] sm:$0xff]  ;;  %v287_v23 = vld [vmem:[%s1201_s21 + $0x68] sm:$0xff]  ;;  %v325_v24 = vmax.f32 %v229_v14, %v285_v15  ;;  %s708_s29 = scalar_lea.sflag [#allocation6], %s1197_s11  ;;  %s974_s30 = scalar_lea.vmem %s1282_s10, 16 }
  0x3f   : > { %v302_v21 = vadd.f32 %v286_v19, %v230_v18  ;;  %v303_v25 = vadd.f32 %v287_v23, %v231_v22  ;;  %v232_v26 = vld [vmem:[%s1201_s21 + $0x70] sm:$0xff]  ;;  %v288_v27 = vld [vmem:[%s1201_s21 + $0x78] sm:$0xff]  ;;  %v326_v28 = vmax.f32 %v230_v18, %v286_v19  ;;  %v327_v31 = vmax.f32 %v231_v22, %v287_v23  ;;  %v510_v33 = vld [vmem:[%s1330_s1] sm:$0xf]  ;;  %p975_p8 = scmp.ne.s32.totalorder %s1282_s10, %s974_s30  ;;  %p1342_p9 = scmp.ne.s32.totalorder %s1336_s25, 0 }
  0x40   : > { %v304_v29 = vadd.f32 %v288_v27, %v232_v26  ;;  %v328_v30 = vmax.f32 %v232_v26, %v288_v27  ;;  %834 = vmatpush3.xpose.msk.msra.mxu0 %vm519_vm0, %v510_v33  ;;  %v511_v34 = vld [vmem:[%s1331_s2] sm:$0xff]  ;;  %v512_v35 = vld [vmem:[%s1331_s2 + $0x8] sm:$0xff]  ;;  %vm1235_vm3 = vmpackc.low %vm597_vm2, %vm597_vm2  ;;  %v410_v56 = vadd.s32 4294967288, %v405_v54  ;;  %v417_v62 = vadd.s32 4294967280, %v405_v54  ;;  %s1064_s15 = smov [#allocation7]  }
  0x41   : > { %354 = vadd.xlane.f32.xlu1 %v300_v10  ;;  %v858_v37 = vpack.c.bf16 %v512_v35, %v511_v34  ;;  %v513_v39 = vld [vmem:[%s1331_s2 + $0x10] sm:$0xff]  ;;  %v514_v40 = vld [vmem:[%s1331_s2 + $0x18] sm:$0xff]  ;;  %v515_v42 = vld [vmem:[%s1331_s2 + $0x20] sm:$0xff]  ;;  %v408_v0 = vsub.s32 %v405_v54, %v407_v58  ;;  %v424_v2 = vadd.s32 4294967272, %v405_v54  ;;  %v431_v4 = vadd.s32 4294967264, %v405_v54  ;;  %p976_p11 = pnand %p975_p8, %p1342_p9  ;;  %s978_s4 = sshll.u32 %s1064_s15, 4  ;;  %s979_s4 = int_to_ptr.vmem [resolvable:$false] %s978_s4 }
  0x42   : > { %350 = vadd.xlane.f32.xlu0 %v298_v11  ;;  %v862_v41 = vpack.c.bf16 %v514_v40, %v513_v39  ;;  %v516_v43 = vld [vmem:[%s1331_s2 + $0x28] sm:$0xff]  ;;  %v517_v45 = vld [vmem:[%s1331_s2 + $0x30] sm:$0xff]  ;;  %v518_v46 = vld [vmem:[%s1331_s2 + $0x38] sm:$0xff]  ;;  %v413_v60 = vsub.s32 %v410_v56, %v407_v58  ;;  %v438_v5 = vadd.s32 4294967256, %v405_v54  ;;  %v420_v7 = vsub.s32 %v417_v62, %v407_v58  ;;  %s980_s5 = scalar_lea.vmem %s979_s4, 32  ;;  %p981_p6 = scmp.lt.s32.totalorder %s1282_s10, %s979_s4 }
  0x43   : > { %860 = vmatpush3.bf16.xpose.msk.msra.mxu1 %vm1235_vm3, %v858_v37  ;;  %v866_v44 = vpack.c.bf16 %v516_v43, %v515_v42  ;;  %v870_v47 = vpack.c.bf16 %v518_v46, %v517_v45  ;;  %v445_v10 = vadd.s32 4294967248, %v405_v54  ;;  %v452_v15 = vadd.s32 4294967240, %v405_v54  ;;  %p977_p0 = pneg %p976_p11  ;;  %p982_p13 = scmp.lt.s32.totalorder %s980_s5, %s974_s30 }
  0x44   : > { %861 = vmatprep.subr.bf16.mxu1 %v1063_v36  ;;  %v441_v18 = vsub.s32 %v438_v5, %v407_v58  ;;  %vm429_vm6 = vcmask 261312   ;;  %vm436_vm7 = vcmask 326912   ;;  %vm443_vm8 = vcmask 392512  }
  0x45   : > { %382 = vmax.xlane.f32.xlu1 %v322_v12  ;;  %v427_v12 = vsub.s32 %v424_v2, %v407_v58  ;;  %vm450_vm9 = vcmask 458112   ;;  %vm457_vm10 = vcmask 523712   ;;  %vm508_vm11 = vcmask 1040384   ;;  %p983_p2 = por %p982_p13, %p981_p6 }
  0x46   : > { %380 = vmax.xlane.f32.xlu0 %v321_v13  ;;  %vm705_vm12 = vcmask 516096  }
  0x47   : > { %p984_p5 = pnand %p983_p2, %p977_p0 }
  0x49   : > { %384 = vmax.xlane.f32.xlu1 %v323_v16  ;;  %v434_v16 = vsub.s32 %v431_v4, %v407_v58 }
  0x4a   : > { %356 = vadd.xlane.f32.xlu0 %v301_v17 }
  0x4b   : > { %864 = vmatpush3.bf16.xpose.msk.msra.mxu1 %vm1235_vm3, %v862_v41 }
  0x4c   : > { %865 = vmatprep.subr.bf16.mxu1 %v1063_v36 }
  0x4d   : > { %386 = vmax.xlane.f32.xlu1 %v324_v20 }
  0x4e   : > { %358 = vadd.xlane.f32.xlu0 %v302_v21 }
  0x51   : > { %388 = vmax.xlane.f32.xlu1 %v325_v24 }
  0x52   : > { %360 = vadd.xlane.f32.xlu0 %v303_v25  ;;  %v448_v25 = vsub.s32 %v445_v10, %v407_v58 }
  0x53   : > { %868 = vmatpush3.bf16.xpose.msk.msra.mxu1 %vm1235_vm3, %v866_v44 }
  0x54   : > { %869 = vmatprep.subr.bf16.mxu1 %v1063_v36 }
  0x55   : > { %390 = vmax.xlane.f32.xlu1 %v326_v28 }
  0x56   : > { %362 = vadd.xlane.f32.xlu0 %v304_v29 }
  0x59   : > { %394 = vmax.xlane.f32.xlu1 %v328_v30  ;;  %v455_v30 = vsub.s32 %v452_v15, %v407_v58 }
  0x5a   : > { %392 = vmax.xlane.f32.xlu0 %v327_v31 }
  0x5b   : > { %872 = vmatpush3.bf16.xpose.msk.msra.mxu1 %vm1235_vm3, %v870_v47 }
  0xca   : > { %v353_v48 = vpop.xlane.xlu1 %352 }
  0xcb   : > { %v349_v49 = vpop.xlane.xlu0 %348  ;;  %v366_v8 = vmul.f32 0.00390625, %v353_v48 }
  0xcc   : > { %v364_v1 = vmul.f32 0.00390625, %v349_v49 }
  0xcd   : > { %v421_v23 = vrot.slane %v366_v8, %v420_v7 }
  0xce   : > { %v355_v50 = vpop.xlane.xlu1 %354  ;;  %v409_v11 = vrot.slane %v364_v1, %v408_v0 }
  0xcf   : > { %v351_v52 = vpop.xlane.xlu0 %350  ;;  %v367_v13 = vmul.f32 0.00390625, %v355_v50 }
  0xd0   : > { %v365_v61 = vmul.f32 0.00390625, %v351_v52 }
  0xd1   : > { %v428_v28 = vrot.slane %v367_v13, %v427_v12 }
  0xd2   : > { %v383_v53 = vpop.xlane.xlu1 %382  ;;  %v414_v6 = vrot.slane %v365_v61, %v413_v60 }
  0xd3   : > { %v381_v55 = vpop.xlane.xlu0 %380  ;;  %v475_v20 = vrot.slane %v383_v53, %v413_v60 }
  0xd4   : > { %v416_v19 = vsel %vm415_vm4, %v414_v6, %v409_v11  ;;  %v471_v21 = vrot.slane %v381_v55, %v408_v0 }
  0xd5   : > { %v423_v32 = vsel %vm422_vm5, %v421_v23, %v416_v19 }
  0xd6   : > { %v385_v57 = vpop.xlane.xlu1 %384  ;;  %v476_v36 = vsel %vm415_vm4, %v475_v20, %v471_v21  ;;  %v430_v42 = vsel %vm429_vm6, %v428_v28, %v423_v32 }
  0xd7   : > { %v357_v59 = vpop.xlane.xlu0 %356  ;;  %v480_v24 = vrot.slane %v385_v57, %v420_v7 }
  0xd8   : > { %v368_v17 = vmul.f32 0.00390625, %v357_v59 }
  0xd9   : > { %v481_v39 = vsel %vm422_vm5, %v480_v24, %v476_v36 }
  0xda   : > { %v387_v63 = vpop.xlane.xlu1 %386  ;;  %v435_v33 = vrot.slane %v368_v17, %v434_v16 }
  0xdb   : > { %v359_v3 = vpop.xlane.xlu0 %358  ;;  %v485_v29 = vrot.slane %v387_v63, %v427_v12 }
  0xdc   : > { %v369_v22 = vmul.f32 0.00390625, %v359_v3  ;;  %v437_v47 = vsel %vm436_vm7, %v435_v33, %v430_v42 }
  0xdd   : > { %v486_v43 = vsel %vm429_vm6, %v485_v29, %v481_v39 }
  0xde   : > { %v389_v9 = vpop.xlane.xlu1 %388  ;;  %v442_v37 = vrot.slane %v369_v22, %v441_v18 }
  0xdf   : > { %v361_v14 = vpop.xlane.xlu0 %360  ;;  %v490_v34 = vrot.slane %v389_v9, %v434_v16 }
  0xe0   : > { %v370_v26 = vmul.f32 0.00390625, %v361_v14  ;;  %v444_v50 = vsel %vm443_vm8, %v442_v37, %v437_v47 }
  0xe1   : > { %v491_v48 = vsel %vm436_vm7, %v490_v34, %v486_v43 }
  0xe2   : > { %v391_v27 = vpop.xlane.xlu1 %390  ;;  %v449_v40 = vrot.slane %v370_v26, %v448_v25 }
  0xe3   : > { %v363_v31 = vpop.xlane.xlu0 %362  ;;  %v495_v38 = vrot.slane %v391_v27, %v441_v18 }
  0xe4   : > { %v371_v35 = vmul.f32 0.00390625, %v363_v31  ;;  %v451_v52 = vsel %vm450_vm9, %v449_v40, %v444_v50 }
  0xe5   : > { %v496_v51 = vsel %vm443_vm8, %v495_v38, %v491_v48 }
  0xe6   : > { %v395_v41 = vpop.xlane.xlu1 %394  ;;  %v456_v44 = vrot.slane %v371_v35, %v455_v30 }
  0xe7   : > { %v393_v45 = vpop.xlane.xlu0 %392  ;;  %v505_v46 = vrot.slane %v395_v41, %v455_v30 }
  0xe8   : > { %v500_v49 = vrot.slane %v393_v45, %v448_v25  ;;  %v458_v55 = vsel %vm457_vm10, %v456_v44, %v451_v52 }
  0xea   : > { %v501_v53 = vsel %vm450_vm9, %v500_v49, %v496_v51 }
  0xeb   : > { %v506_v54 = vsel %vm457_vm10, %v505_v46, %v501_v53 }
  0xec   : > { %v509_v56 = vsel %vm508_vm11, %v458_v55, %v506_v54 }
  0xed   : > { %836 = vmatmul.mubr.msk.f32.vlgmr.msra.gmra.mrb[0].mxu0 %vm519_vm0, %v509_v56 }
 0x1c0   : > { %v592_v57 = vpop.f32.mrb[0].mxu0 }
 0x1c1   : > { %v596_v58 = vmax.f32 %v592_v57, 0.0  ;;  %v837_v59 = vpop.f32.mrb[1].mxu0 }
 0x1c3   : > { %855 = vmatmul.mubr.msk.f32.vlgmr.msra.gmra.mrb[0].mxu1 %vm597_vm2, %v596_v58 }
 0x296   : > { %v691_v60 = vpop.f32.mrb[0].mxu1 }
 0x297   : > { %v696_v61 = vrot.slane %v691_v60, 1  ;;  %v856_v62 = vpop.f32.mrb[1].mxu1 }
 0x299   : > { %v698_v63 = vadd.f32 %v696_v61, %v691_v60 }
 0x29b   : > { %v817_v0 = vmul.f32 -1.442695, %v698_v63 }
 0x29d   : > { %940 = vpow2.f32 %v817_v0 }
 0x2a7   : > { %v941_v1 = vpop.eup %940 }
 0x2a8   : > { %v702_v2 = vadd.f32 1.0, %v941_v1 }
 0x2aa   : > { %942 = vrcp.f32 %v702_v2 }
 0x2b4   : > { %v943_v3 = vpop.eup %942 }
 0x2b5   : > { %706 = vst.msk [vmem:[%s203_s9] sm:$0x1] %vm705_vm12, %v943_v3 }
 0x2b6   : > { %987 = shalt.err (!%p984_p5)
}
 0x2b7   : > { %s988_s11 = scalar_lea.hbm %s1280_s28, 16  ;;  %s992_s19 = scalar_lea.hbm %s1332_s3, 32 }
 0x2b8   : > { %p989_p4 = scmp.ne.s32.totalorder %s1280_s28, %s988_s11  ;;  %p993_p12 = scmp.lt.u32.totalorder %s1280_s28, %s1332_s3 }
 0x2b9   : > { %p994_p1 = scmp.lt.u32.totalorder %s992_s19, %s988_s11  ;;  %p996_p8 = scmp.lt.u32.totalorder %s988_s11, %s1280_s28 }
 0x2ba   : > { %p990_p7 = pnand %p989_p4, %p1342_p9 }
 0x2bb   : > { %p995_p3 = por %p994_p1, %p993_p12 }
 0x2bc   : > { %p991_p10 = pneg %p990_p7 }
 0x2bd   : > { %p997_p11 = por %p996_p8, %p995_p3 }
 0x2bf   : > { %p998_p0 = pnand %p997_p11, %p991_p10 }
 0x2c1   : > { %1001 = shalt.err (!%p998_p0)
}
 0x2c2   : > { %875 = dma.vmem_to_hbm [thread:$0]  (%p1342_p9), %s1282_s10, 16, %s1280_s28, %s708_s29  }
 0x2c3 PF: > { %s732_s6 = sand.u32 1, %s1036_s12   ;;  %p1343_p6 = scmp.ne.s32.totalorder %s1337_s27, 0 }
 0x2c4   : > { %p1344_p13 = scmp.ge.s32.totalorder %s1056_s17, 2  ;;  %s733_s8 = scalar_lea.sflag [#allocation6], %s732_s6 }
 0x2c6   : > { %p882_p2 = pnand %p1344_p13, %p1343_p6 }
 0x2c8   : > { %1031 = dma.done.wait (!%p882_p2), %s733_s8, 16  }
 0x2c9   : > { %1033 = vsyncadd (!%p882_p2), %s733_s8, 4294967280  ;;  %s19_s17 = sadd.s32 1, %s1056_s17   ;;  %s1345_s12 = smov %s1040_s13 }
 0x2ca   : > { %p16_p5 = scmp.ge.s32.totalorder %s19_s17, 4   ;;  %s1346_s13 = smov %s1044_s14 }
 0x2cb   : > { %s1347_s14 = smov %s1141_s26  ;;  %s1348_s15 = smov %s1052_s16 }
 0x2cc   : > { %s1349_s16 = smov %s1351_s20  ;;  %18 = sbr.rel (!%p16_p5) target bundleno = 6 (0x6), region = 85 }
 0x2d3   :  { %737 = vsyncpa [#allocation5], 1 }
 0x2d4   :  { %739 = vsyncpa [#allocation5 + $0x1], 1 }
 0x2d5   :  { %740 = vsyncpa [#allocation6], 1 }
 0x2d6   :  { %742 = vsyncpa [#allocation6 + $0x1], 1 }

</bundles_post_ra>
